<compile_context>
chip_gen: v5e
topology: v5e:2x2
jax: 0.10.0
libtpu: 0.0.40
codegen_flags: <defaults>
</compile_context>

<pallas_src>
import jax
import jax.numpy as jnp
from jax import lax
from jax.experimental import pallas as pl
from jax.experimental.pallas import tpu as pltpu

LN_EPS = 1e-12


def _bert_embeddings_kernel(w_ref, pos_ref, ids_ref, tab_ref, g_ref, b_ref, o_ref):
    # w_ref:   (Ts, H)  word embeddings for this row tile
    # pos_ref: (Ts, H)  position embeddings for this row tile
    # ids_ref: (Ts, 1)  int32 token-type ids for this row tile
    # tab_ref: (V, H)   token-type embedding table (V is tiny, e.g. 2)
    # g_ref:   (1, H)   LayerNorm weight
    # b_ref:   (1, H)   LayerNorm bias
    # o_ref:   (Ts, H)  output
    x = w_ref[...] + pos_ref[...]                    # (Ts, H) f32

    # Token-type lookup on the VPU: broadcast compare + select per table row.
    # V is a small static constant, so this unrolls to V selects (free filler
    # under the HBM stalls) instead of a K=V MXU contraction.
    ids = ids_ref[...]                               # (Ts, 1) int32
    tab = tab_ref[...]                               # (V, H)
    V = tab.shape[0]
    for v in range(V):
        x = x + jnp.where(ids == v, tab[v:v + 1, :], 0.0)

    # LayerNorm over the hidden (lane) dim, TF-style eps inside the sqrt.
    u = jnp.mean(x, axis=-1, keepdims=True)
    d = x - u
    s = jnp.mean(d * d, axis=-1, keepdims=True)
    xn = d * lax.rsqrt(s + LN_EPS)                   # rsqrt -> EUP, no divide

    o_ref[...] = (g_ref[...] * xn + b_ref[...]).astype(o_ref.dtype)


def _pick_seq_tile(S, max_rows=512):
    """Largest row tile <= max_rows that divides S and satisfies the (8,128) rule."""
    if S <= max_rows:
        return S  # full-dim block is always legal
    for t in range(max_rows, 0, -1):
        if S % t == 0 and t % 8 == 0:
            return t
    return S  # fall back to the whole sequence


def bert_embeddings(words_embeddings, token_type_ids, pos_table, tt_table,
                    ln_weight, ln_bias, out_dtype=None):
    """words_embeddings: (B, S, H) f32, token_type_ids: (B, S) int.

    Matches BertEmbeddings.forward(words_embeddings, token_type_ids) with
    add_position_emb=True and type_vocab_size>0.
    """
    B, S, H = words_embeddings.shape
    V = tt_table.shape[0]
    if out_dtype is None:
        out_dtype = words_embeddings.dtype

    Ts = _pick_seq_tile(S)
    num_s = S // Ts

    # Wrapper-side glue (index construction only; no big HBM temporaries).
    pos_slice = pos_table[:S]                                   # (S, H)
    ids3 = token_type_ids.astype(jnp.int32).reshape(B, S, 1)    # (B, S, 1)
    gamma2 = ln_weight.reshape(1, H)
    beta2 = ln_bias.reshape(1, H)

    # Grid (s outer, b inner): the pos tile's block index depends only on s,
    # so it is fetched once per s tile instead of once per (s, b) step.
    grid = (num_s, B)

    return pl.pallas_call(
        _bert_embeddings_kernel,
        out_shape=jax.ShapeDtypeStruct((B, S, H), out_dtype),
        grid_spec=pltpu.PrefetchScalarGridSpec(
            num_scalar_prefetch=0,
            grid=grid,
            in_specs=[
                pl.BlockSpec((None, Ts, H), lambda s, b: (b, s, 0)),  # words (squeezed b)
                pl.BlockSpec((Ts, H),       lambda s, b: (s, 0)),     # position emb
                pl.BlockSpec((None, Ts, 1), lambda s, b: (b, s, 0)),  # token-type ids
                pl.BlockSpec((V, H),        lambda s, b: (0, 0)),     # token-type table
                pl.BlockSpec((1, H),        lambda s, b: (0, 0)),     # LN gamma
                pl.BlockSpec((1, H),        lambda s, b: (0, 0)),     # LN beta
            ],
            out_specs=pl.BlockSpec((None, Ts, H), lambda s, b: (b, s, 0)),
        ),
        compiler_params=pltpu.CompilerParams(
            dimension_semantics=("parallel", "parallel")),
    )(words_embeddings, pos_slice, ids3, tt_table, gamma2, beta2)


def _reference(words, token_type_ids, pos_table, tt_table, gamma, beta):
    B, S, H = words.shape
    x = words + pos_table[:S][None, :, :]
    x = x + tt_table[token_type_ids]
    u = jnp.mean(x, axis=-1, keepdims=True)
    s = jnp.mean((x - u) ** 2, axis=-1, keepdims=True)
    xn = (x - u) / jnp.sqrt(s + LN_EPS)
    return gamma * xn + beta


if __name__ == "__main__":
    # Small config consistent with the module.
    B, S, H = 2, 8, 32
    MAX_POS, TYPE_VOCAB = 16, 2

    key = jax.random.PRNGKey(0)
    k_w, k_p, k_t, k_ids = jax.random.split(key, 4)

    words = jax.random.normal(k_w, (B, S, H), dtype=jnp.float32)
    pos_table = 0.02 * jax.random.normal(k_p, (MAX_POS, H), dtype=jnp.float32)
    tt_table = 0.02 * jax.random.normal(k_t, (TYPE_VOCAB, H), dtype=jnp.float32)
    token_type_ids = jax.random.randint(k_ids, (B, S), 0, TYPE_VOCAB, dtype=jnp.int32)
    ln_weight = jnp.ones((H,), dtype=jnp.float32)   # BertLayerNorm init
    ln_bias = jnp.zeros((H,), dtype=jnp.float32)

    out = bert_embeddings(words, token_type_ids, pos_table, tt_table, ln_weight, ln_bias)
    out = jax.block_until_ready(out)

    ref = _reference(words, token_type_ids, pos_table, tt_table, ln_weight, ln_bias)
    assert out.shape == (B, S, H)
    assert jnp.allclose(out, ref, atol=1e-5, rtol=1e-5), "mismatch vs reference"

    print("KERNEL_OK")
</pallas_src>

<mosaic_0001>
module attributes {stable_mosaic.version = 11 : i64} {
  func.func @_bert_embeddings_kernel(%arg0: i32, %arg1: i32, %arg2: memref<1x8x32xf32, #tpu.memory_space<vmem>>, %arg3: memref<8x32xf32, #tpu.memory_space<vmem>>, %arg4: memref<1x8x1xi32, #tpu.memory_space<vmem>>, %arg5: memref<2x32xf32, #tpu.memory_space<vmem>>, %arg6: memref<1x32xf32, #tpu.memory_space<vmem>>, %arg7: memref<1x32xf32, #tpu.memory_space<vmem>>, %arg8: memref<1x8x32xf32, #tpu.memory_space<vmem>>) attributes {dimension_semantics = [#tpu.dimension_semantics<parallel>, #tpu.dimension_semantics<parallel>], iteration_bounds = array<i64: 1, 2>, scalar_prefetch = 0 : i64, scratch_operands = 0 : i64, tpu.core_type = #tpu.core_type<tc>, window_params = [{transform_indices = @transform_0, window_bounds = array<i64: 1, 8, 32>}, {transform_indices = @transform_1, window_bounds = array<i64: 8, 32>}, {transform_indices = @transform_2, window_bounds = array<i64: 1, 8, 1>}, {pipeline_mode = #tpu.pipeline_mode<synchronous>, transform_indices = @transform_3, window_bounds = array<i64: 2, 32>}, {pipeline_mode = #tpu.pipeline_mode<synchronous>, transform_indices = @transform_4, window_bounds = array<i64: 1, 32>}, {pipeline_mode = #tpu.pipeline_mode<synchronous>, transform_indices = @transform_5, window_bounds = array<i64: 1, 32>}, {transform_indices = @transform_6, window_bounds = array<i64: 1, 8, 32>}]} {
    %c0 = arith.constant 0 : index
    %c0_0 = arith.constant 0 : index
    %c0_1 = arith.constant 0 : index
    %0 = vector.load %arg2[%c0, %c0_0, %c0_1] : memref<1x8x32xf32, #tpu.memory_space<vmem>>, vector<1x8x32xf32>
    %1 = vector.shape_cast %0 : vector<1x8x32xf32> to vector<8x32xf32>
    %c0_2 = arith.constant 0 : index
    %c0_3 = arith.constant 0 : index
    %2 = vector.load %arg3[%c0_2, %c0_3] : memref<8x32xf32, #tpu.memory_space<vmem>>, vector<8x32xf32>
    %3 = arith.addf %1, %2 : vector<8x32xf32>
    %c0_4 = arith.constant 0 : index
    %c0_5 = arith.constant 0 : index
    %c0_6 = arith.constant 0 : index
    %4 = vector.load %arg4[%c0_4, %c0_5, %c0_6] : memref<1x8x1xi32, #tpu.memory_space<vmem>>, vector<1x8x1xi32>
    %5 = vector.shape_cast %4 : vector<1x8x1xi32> to vector<8x1xi32>
    %c0_7 = arith.constant 0 : index
    %c0_8 = arith.constant 0 : index
    %6 = vector.load %arg5[%c0_7, %c0_8] : memref<2x32xf32, #tpu.memory_space<vmem>>, vector<2x32xf32>
    %c0_i32 = arith.constant 0 : i32
    %7 = vector.broadcast %c0_i32 : i32 to vector<8x1xi32>
    %8 = arith.cmpi eq, %5, %7 : vector<8x1xi32>
    %9 = vector.extract_strided_slice %6 {offsets = [0, 0], sizes = [1, 32], strides = [1, 1]} : vector<2x32xf32> to vector<1x32xf32>
    %cst = arith.constant 0.000000e+00 : f32
    %10 = vector.shape_cast %8 : vector<8x1xi1> to vector<8x1xi1>
    %11 = vector.broadcast %10 : vector<8x1xi1> to vector<8x32xi1>
    %12 = vector.shape_cast %9 : vector<1x32xf32> to vector<1x32xf32>
    %13 = vector.broadcast %12 : vector<1x32xf32> to vector<8x32xf32>
    %14 = vector.broadcast %cst : f32 to vector<8x32xf32>
    %15 = arith.select %11, %13, %14 : vector<8x32xi1>, vector<8x32xf32>
    %16 = arith.addf %3, %15 : vector<8x32xf32>
    %c1_i32 = arith.constant 1 : i32
    %17 = vector.broadcast %c1_i32 : i32 to vector<8x1xi32>
    %18 = arith.cmpi eq, %5, %17 : vector<8x1xi32>
    %19 = vector.extract_strided_slice %6 {offsets = [1, 0], sizes = [1, 32], strides = [1, 1]} : vector<2x32xf32> to vector<1x32xf32>
    %cst_9 = arith.constant 0.000000e+00 : f32
    %20 = vector.shape_cast %18 : vector<8x1xi1> to vector<8x1xi1>
    %21 = vector.broadcast %20 : vector<8x1xi1> to vector<8x32xi1>
    %22 = vector.shape_cast %19 : vector<1x32xf32> to vector<1x32xf32>
    %23 = vector.broadcast %22 : vector<1x32xf32> to vector<8x32xf32>
    %24 = vector.broadcast %cst_9 : f32 to vector<8x32xf32>
    %25 = arith.select %21, %23, %24 : vector<8x32xi1>, vector<8x32xf32>
    %26 = arith.addf %16, %25 : vector<8x32xf32>
    %cst_10 = arith.constant dense<0.000000e+00> : vector<8xf32>
    %27 = vector.multi_reduction <add>, %26, %cst_10 [1] : vector<8x32xf32> to vector<8xf32>
    %28 = vector.shape_cast %27 : vector<8xf32> to vector<8x1xf32>
    %cst_11 = arith.constant 3.200000e+01 : f32
    %29 = vector.broadcast %cst_11 : f32 to vector<8x1xf32>
    %30 = arith.divf %28, %29 : vector<8x1xf32>
    %31 = vector.broadcast %30 : vector<8x1xf32> to vector<8x32xf32>
    %32 = arith.subf %26, %31 : vector<8x32xf32>
    %33 = arith.mulf %32, %32 : vector<8x32xf32>
    %cst_12 = arith.constant dense<0.000000e+00> : vector<8xf32>
    %34 = vector.multi_reduction <add>, %33, %cst_12 [1] : vector<8x32xf32> to vector<8xf32>
    %35 = vector.shape_cast %34 : vector<8xf32> to vector<8x1xf32>
    %cst_13 = arith.constant 3.200000e+01 : f32
    %36 = vector.broadcast %cst_13 : f32 to vector<8x1xf32>
    %37 = arith.divf %35, %36 : vector<8x1xf32>
    %cst_14 = arith.constant 9.99999996E-13 : f32
    %38 = vector.broadcast %cst_14 : f32 to vector<8x1xf32>
    %39 = arith.addf %37, %38 : vector<8x1xf32>
    %40 = math.rsqrt %39 : vector<8x1xf32>
    %41 = vector.broadcast %40 : vector<8x1xf32> to vector<8x32xf32>
    %42 = arith.mulf %32, %41 : vector<8x32xf32>
    %c0_15 = arith.constant 0 : index
    %c0_16 = arith.constant 0 : index
    %43 = vector.load %arg6[%c0_15, %c0_16] : memref<1x32xf32, #tpu.memory_space<vmem>>, vector<1x32xf32>
    %44 = vector.broadcast %43 : vector<1x32xf32> to vector<8x32xf32>
    %45 = arith.mulf %44, %42 : vector<8x32xf32>
    %c0_17 = arith.constant 0 : index
    %c0_18 = arith.constant 0 : index
    %46 = vector.load %arg7[%c0_17, %c0_18] : memref<1x32xf32, #tpu.memory_space<vmem>>, vector<1x32xf32>
    %47 = vector.broadcast %46 : vector<1x32xf32> to vector<8x32xf32>
    %48 = arith.addf %45, %47 : vector<8x32xf32>
    %c0_19 = arith.constant 0 : index
    %c0_20 = arith.constant 0 : index
    %c0_21 = arith.constant 0 : index
    %49 = vector.load %arg8[%c0_19, %c0_20, %c0_21] : memref<1x8x32xf32, #tpu.memory_space<vmem>>, vector<1x8x32xf32>
    %50 = vector.shape_cast %49 : vector<1x8x32xf32> to vector<8x32xf32>
    %51 = vector.shape_cast %48 : vector<8x32xf32> to vector<1x8x32xf32>
    tpu.vector_store %arg8[%c0_19, %c0_20, %c0_21], %51 {strides = array<i32>} : memref<1x8x32xf32, #tpu.memory_space<vmem>>, vector<1x8x32xf32>,
    return
  }
  func.func @transform_0(%arg0: i32, %arg1: i32) -> (i32, i32, i32) {
    %c0_i32 = arith.constant 0 : i32
    %c0_i32_0 = arith.constant 0 : i32
    return %arg1, %arg0, %c0_i32 : i32, i32, i32
  }
  func.func @transform_1(%arg0: i32, %arg1: i32) -> (i32, i32) {
    %c0_i32 = arith.constant 0 : i32
    %c0_i32_0 = arith.constant 0 : i32
    return %arg0, %c0_i32 : i32, i32
  }
  func.func @transform_2(%arg0: i32, %arg1: i32) -> (i32, i32, i32) {
    %c0_i32 = arith.constant 0 : i32
    %c0_i32_0 = arith.constant 0 : i32
    return %arg1, %arg0, %c0_i32 : i32, i32, i32
  }
  func.func @transform_3(%arg0: i32, %arg1: i32) -> (i32, i32) {
    %c0_i32 = arith.constant 0 : i32
    %c0_i32_0 = arith.constant 0 : i32
    %c0_i32_1 = arith.constant 0 : i32
    return %c0_i32, %c0_i32_0 : i32, i32
  }
  func.func @transform_4(%arg0: i32, %arg1: i32) -> (i32, i32) {
    %c0_i32 = arith.constant 0 : i32
    %c0_i32_0 = arith.constant 0 : i32
    %c0_i32_1 = arith.constant 0 : i32
    return %c0_i32, %c0_i32_0 : i32, i32
  }
  func.func @transform_5(%arg0: i32, %arg1: i32) -> (i32, i32) {
    %c0_i32 = arith.constant 0 : i32
    %c0_i32_0 = arith.constant 0 : i32
    %c0_i32_1 = arith.constant 0 : i32
    return %c0_i32, %c0_i32_0 : i32, i32
  }
  func.func @transform_6(%arg0: i32, %arg1: i32) -> (i32, i32, i32) {
    %c0_i32 = arith.constant 0 : i32
    %c0_i32_0 = arith.constant 0 : i32
    return %arg1, %arg0, %c0_i32 : i32, i32, i32
  }
}

</mosaic_0001>

<bundles_post_ra>
// kernel: tpu_custom_call.1
= control target key start
LH: loop header
LB: loop body
LE: loop exit
PB: predicated region body
PF: predicated region fallthrough
CT: control target
= control target key end

     0   :  { %11 = vsyncpa [#allocation3], 0  ;;  %s859_s0 = inlined_call_operand.vmem [shape: f32[2,8,32], index: 0, kind: input, shape index: {}]   ;;  %s860_s1 = inlined_call_operand.hbm [shape: f32[8,32], index: 1, kind: input, shape index: {}]   ;;  %s861_s2 = inlined_call_operand.vmem [shape: s32[2,8,1], index: 2, kind: input, shape index: {}]   ;;  %s862_s3 = inlined_call_operand.vmem [shape: f32[2,32], index: 3, kind: input, shape index: {}]   ;;  %s863_s4 = inlined_call_operand.vmem [shape: f32[1,32], index: 4, kind: input, shape index: {}]   ;;  %s864_s5 = inlined_call_operand.vmem [shape: f32[1,32], index: 5, kind: input, shape index: {}]   ;;  %s865_s6 = inlined_call_operand.hbm [shape: f32[2,8,32], index: 6, kind: output, shape index: {}]  }
   0x1   :  { %12 = vsyncpa [#allocation4], 0 }
   0x2   :  { %14 = vsyncpa [#allocation4 + $0x1], 0  ;;  %s744_s21 = smov 0   ;;  %s746_s22 = smov 0  }
   0x3   :  { %s748_s23 = smov 0   ;;  %s750_s24 = smov 0  }
   0x4   :  { %s752_s25 = smov 0   ;;  %s754_s26 = smov 0  }
   0x5 LB: > { %s503_s27 = sadd.s32 4294967295, %s704_s26   ;;  %s504_s28 = sadd.s32 4294967294, %s704_s26   ;;  %s704_s26 = sphi %s754_s26, %s20_s26   ;;  %s700_s25 = sphi %s752_s25, %s872_s25   ;;  %s696_s24 = sphi %s750_s24, %s871_s24   ;;  %s692_s23 = sphi %s748_s23, %s870_s23   ;;  %s688_s22 = sphi %s746_s22, %s869_s22   ;;  %s684_s21 = sphi %s744_s21, %s868_s21  }
   0x6   : > { %s29_s29 = sadd.s32 1, %s700_s25  ;;  %s186_s30 = sadd.s32 1, %s692_s23 }
   0x7   : > { %p30_p0 = scmp.ge.s32.totalorder %s29_s29, 2  ;;  %p196_p1 = scmp.ne.s32.totalorder %s692_s23, %s688_s22 }
   0x8   : > { %p197_p2 = scmp.eq.s32.totalorder %s503_s27, 1  ;;  %p202_p3 = scmp.ne.s32.totalorder %s688_s22, %s684_s21 }
   0x9   : > { %s874_s29 = smov (%p30_p0, %s29_s29), 0  ;;  %p203_p5 = scmp.eq.s32.totalorder %s504_s28, 1 }
   0xa   : > { %p784_p4 = por %p197_p2, %p196_p1  ;;  %s181_s8 = ssub.s32 %s700_s25, %s874_s29 }
   0xb   : > { %p505_p6 = scmp.ge.s32.totalorder %s704_s26, 1  ;;  %p184_p7 = scmp.eq.s32.totalorder %s181_s8, 0 }
   0xc   : > { %p791_p8 = por %p203_p5, %p202_p3  ;;  %p210_p9 = scmp.lt.s32.totalorder %s704_s26, 3 }
   0xd   : > { %s797_s10 = scalar_select %p184_p7, %s692_s23, %s186_s30  }
   0xe   : > { %p211_p10 = pnand %p505_p6, %p210_p9  ;;  %p531_p11 = scmp.eq.s32.totalorder %s503_s27, 0 }
   0xf   : > { %s224_s13 = sshll.u32 %s860_s1, 4  ;;  %s706_s14 = smov [#allocation2]   ;;  %s225_s13 = int_to_ptr.hbm [resolvable:$true] %s224_s13 }
  0x10   : > { %p523_p12 = pneg %p211_p10  ;;  %s226_s15 = sshll.u32 %s706_s14, 4  ;;  %s227_s15 = int_to_ptr.vmem [resolvable:$true] %s226_s15 }
  0x11   : > { %268 = sbr.rel (%p211_p10) target bundleno = 430 (0x1ae), region = 44 }
  0x12   : > { %p524_p13 = pnand %p531_p11, %p523_p12 }
  0x14   : > { %526 = dma.hbm_to_vmem [thread:$0]  (!%p524_p13), %s225_s13, 128, %s227_s15, [#allocation3]  }
  0x16   : > { %675 = dma.done.wait (%p531_p11), [#allocation3], 128  }
  0x17   : > { %677 = vsyncadd (%p531_p11), [#allocation3], 4294967168  ;;  %p308_p0 = scmp.lt.s32.totalorder %s696_s24, 1  ;;  %v707_v0 = vmov 0   ;;  %v326_v4 = vld [vmem:[%s862_s3] sm:$0x3] }
  0x18   : > { %585 = vset.pattern.permute.xlu0 %v707_v0  ;;  %v333_v6 = vperm.slane %v326_v4, 0  ;;  %v323_v8 = vld [vmem:[#allocation2] sm:$0xff]  ;;  %v342_v11 = vperm.slane %v326_v4, 1  ;;  %vm345_vm4 = vcmask 261120   ;;  %v708_v17 = vmov 32.0   ;;  %s305_s12 = sand.u32 1, %s688_s22  }
  0x19   : > { %s309_s16 = scalar_select %p308_p0, %s696_s24, 1  ;;  %588 = vrcp.f32 %v708_v17  ;;  %v586_v38 = vld [vmem:[%s863_s4] ss:$0 sm:$0xff] }
  0x1a   : > { %s510_s13 = sshll.u32 %s305_s12, 3  ;;  %s514_s14 = sshll.u32 %s696_s24, 3  ;;  %v587_v41 = vld [vmem:[%s864_s5] ss:$0 sm:$0xff] }
  0x1b   : > { %s511_s17 = sshll.u32 %s309_s16, 3  ;;  %s398_s19 = scalar_lea.hbm %s865_s6, %s514_s14 }
  0x1c   : > { %s321_s20 = scalar_lea.vmem %s861_s2, %s511_s17  ;;  %s314_s30 = scalar_lea.vmem %s859_s0, %s511_s17 }
  0x1d   : > { %v325_v1 = vld [vmem:[%s321_s20] sm:$0xff]  ;;  %s307_s28 = scalar_lea.vmem [#allocation5], %s510_s13  ;;  %s387_s8 = scalar_lea.sflag [#allocation4], %s305_s12 }
  0x1e   : > { %vm327_vm0 = vcmp.eq.s32.totalorder %v325_v1, 0  ;;  %vm336_vm1 = vcmp.eq.s32.totalorder %v325_v1, 1  ;;  %v322_v7 = vld [vmem:[%s314_s30] sm:$0xff]  ;;  %s400_s24 = sshll.u32 %s307_s28, 4  ;;  %s402_s30 = sshll.u32 %s398_s19, 4  ;;  %s401_s24 = int_to_ptr.vmem [resolvable:$true] %s400_s24  ;;  %s403_s30 = int_to_ptr.hbm [resolvable:$true] %s402_s30 }
  0x1f   : > { %v328_v2 = vsel %vm327_vm0, 1, %v707_v0  ;;  %v337_v3 = vsel %vm336_vm1, 1, %v707_v0  ;;  %v324_v9 = vadd.f32 %v323_v8, %v322_v7  ;;  %v589_v18 = vpop.eup %588  ;;  %s636_s11 = sshra.s32 %s403_s30, 4  ;;  %s642_s13 = scalar_lea.hbm %s865_s6, 16  ;;  %s637_s11 = int_to_ptr.hbm [resolvable:$true] %s636_s11 }
  0x20   : > { %330 = vperm.xlu0 %585, %v328_v2   ;;  %v350_v19 = vmul.f32 32.0, %v589_v18  ;;  %vm354_vm5 = vweird.f32 %v589_v18  ;;  %s638_s14 = scalar_lea.hbm %s637_s11, 8  ;;  %p643_p5 = scmp.lt.s32.totalorder %s637_s11, %s865_s6 }
  0x21   : > { %p639_p1 = scmp.ne.s32.totalorder %s637_s11, %s638_s14  ;;  %p644_p6 = scmp.lt.s32.totalorder %s642_s13, %s638_s14 }
  0x22   : > { %v351_v20 = vsub.f32 1.0, %v350_v19 }
  0x23   : > { %p640_p2 = pnand %p639_p1, %p784_p4  ;;  %p645_p7 = por %p644_p6, %p643_p5 }
  0x24   : > { %v352_v21 = vmul.f32 %v589_v18, %v351_v20 }
  0x25   : > { %p641_p3 = pneg %p640_p2 }
  0x26   : > { %v353_v22 = vadd.f32 %v589_v18, %v352_v21 }
  0x27   : > { %p646_p9 = pnand %p645_p7, %p641_p3 }
  0x28   : > { %339 = vperm.xlu0 %585, %v337_v3   ;;  %v355_v23 = vsel %vm354_vm5, %v589_v18, %v353_v22 }
  0x92   : > { %v331_v5 = vpop.permute.xlu0 %330 }
  0x93   : > { %vm332_vm2 = vcmp.eq.s32.totalorder %v331_v5, 1 }
  0x94   : > { %v334_v10 = vsel %vm332_vm2, %v333_v6, 0.0 }
  0x95   : > { %v335_v13 = vadd.f32 %v334_v10, %v324_v9 }
  0x9a   : > { %v340_v12 = vpop.permute.xlu0 %339 }
  0x9b   : > { %vm341_vm3 = vcmp.eq.s32.totalorder %v340_v12, 1 }
  0x9c   : > { %v343_v14 = vsel %vm341_vm3, %v342_v11, 0.0 }
  0x9d   : > { %v344_v15 = vadd.f32 %v343_v14, %v335_v13 }
  0x9f   : > { %v346_v16 = vsel %vm345_vm4, %v344_v15, 0.0 }
  0xa0   : > { %347 = vadd.xlane.f32.xlu1 %v346_v16 }
 0x113   : > { %v348_v24 = vpop.xlane.xlu1 %347 }
 0x114   : > { %v356_v25 = vmul.f32 %v355_v23, %v348_v24 }
 0x116   : > { %v357_v26 = vsub.f32 %v344_v15, %v356_v25 }
 0x118   : > { %v358_v27 = vmul.f32 %v357_v26, %v357_v26 }
 0x11a   : > { %v359_v28 = vsel %vm345_vm4, %v358_v27, 0.0 }
 0x11b   : > { %360 = vadd.xlane.f32.xlu1 %v359_v28 }
 0x18e   : > { %v361_v29 = vpop.xlane.xlu1 %360 }
 0x18f   : > { %v362_v30 = vmul.f32 %v361_v29, %v355_v23 }
 0x191   : > { %v363_v31 = vadd.f32 1e-12, %v362_v30 }
 0x193   : > { %590 = vrsqrt.f32 %v363_v31  ;;  %vm370_vm7 = vweird.f32 %v363_v31 }
 0x199   : > { %v591_v32 = vpop.eup %590 }
 0x19a   : > { %v365_v33 = vmul.f32 %v591_v32, %v363_v31  ;;  %vm371_vm6 = vweird.f32 %v591_v32 }
 0x19b   : > { %vm372_vm8 = vmor %vm370_vm7, %vm371_vm6 }
 0x19c   : > { %v366_v34 = vmul.f32 %v591_v32, %v365_v33 }
 0x19e   : > { %v367_v35 = vmul.f32 0.5, %v366_v34 }
 0x1a0   : > { %v368_v36 = vsub.f32 1.5, %v367_v35 }
 0x1a2   : > { %v369_v37 = vmul.f32 %v591_v32, %v368_v36 }
 0x1a4   : > { %v373_v39 = vsel %vm372_vm8, %v591_v32, %v369_v37 }
 0x1a5   : > { %v374_v40 = vmul.f32 %v373_v39, %v357_v26 }
 0x1a7   : > { %v379_v42 = vmul.f32 %v586_v38, %v374_v40 }
 0x1a9   : > { %v384_v43 = vadd.f32 %v587_v41, %v379_v42 }
 0x1ab   : > { %385 = vst.msk [vmem:[%s307_s28] sm:$0xff] %vm345_vm4, %v384_v43 }
 0x1ac   : > { %649 = shalt.err (!%p646_p9)
}
 0x1ad   : > { %521 = dma.vmem_to_hbm [thread:$0]  (%p784_p4), %s401_s24, 128, %s403_s30, %s387_s8  }
 0x1ae PF: > { %p533_p10 = scmp.ge.s32.totalorder %s704_s26, 2  ;;  %s414_s12 = sand.u32 1, %s684_s21  }
 0x1af   : > { %s415_s19 = scalar_lea.sflag [#allocation4], %s414_s12 }
 0x1b0   : > { %p528_p11 = pnand %p533_p10, %p791_p8 }
 0x1b2   : > { %p529_p12 = pneg %p528_p11 }
 0x1b4   : > { %679 = dma.done.wait (%p529_p12), %s415_s19, 128  }
 0x1b5   : > { %681 = vsyncadd (%p529_p12), %s415_s19, 4294967168  ;;  %s20_s26 = sadd.s32 1, %s704_s26   ;;  %s868_s21 = smov %s688_s22 }
 0x1b6   : > { %p17_p13 = scmp.ge.s32.totalorder %s20_s26, 4   ;;  %s869_s22 = smov %s692_s23 }
 0x1b7   : > { %s870_s23 = smov %s797_s10  ;;  %s871_s24 = smov %s700_s25 }
 0x1b8   : > { %s872_s25 = smov %s874_s29  ;;  %19 = sbr.rel (!%p17_p13) target bundleno = 5 (0x5), region = 88 }
 0x1bd   :  { %421 = vsyncpa [#allocation3], 1 }
 0x1be   :  { %423 = vsyncpa [#allocation3 + $0x1], 1 }
 0x1bf   :  { %424 = vsyncpa [#allocation4], 1 }
 0x1c0   :  { %426 = vsyncpa [#allocation4 + $0x1], 1 }

</bundles_post_ra>
